<compile_context>
chip_gen: v7x
topology: tpu7x:2x2x1
jax: 0.10.0
libtpu: 0.0.40
codegen_flags: <defaults>
</compile_context>

<pallas_src>
import functools

import jax
import jax.numpy as jnp
from jax.experimental import pallas as pl
from jax.experimental.pallas import tpu as pltpu


# ---------------------------------------------------------------------------
# Kernel
# ---------------------------------------------------------------------------
def _upsample_kernel(x_ref, w_ref, b_ref, d_ref, o_ref, *, n_groups, group_w):
    # x_ref: (1, Cin, TH*W)        flattened-spatial chunk of the NCHW input
    # w_ref: (Cout, Cin)           1x1 conv weight with BN scale folded in
    # b_ref: (Cout, 1)             folded BN bias
    # d_ref: (g*W, 4*g*W)          block-diagonal 0/1 duplication matrix
    # o_ref: (1, Cout, TH*4*W)     flat output block (both 2x dups encoded)
    x = x_ref[0]                                                     # (Cin, TH*W)
    y = jnp.dot(w_ref[...], x, preferred_element_type=jnp.float32)   # (Cout, TH*W)
    y = y + b_ref[...]                                               # folded BN
    y = jnp.maximum(y, 0.1 * y)                                      # LeakyReLU(0.1)

    d = d_ref[...]                                                   # (g*W, 4*g*W)
    out_w = 4 * group_w
    for grp in range(n_groups):                                      # TH // g groups
        seg = y[:, grp * group_w:(grp + 1) * group_w]                # (Cout, g*W)
        z = jnp.dot(seg, d, preferred_element_type=jnp.float32)      # (Cout, 4*g*W)
        o_ref[0, :, grp * out_w:(grp + 1) * out_w] = z.astype(o_ref.dtype)


# ---------------------------------------------------------------------------
# Tiling heuristics
# ---------------------------------------------------------------------------
def _vmem_limit_bytes():
    """Per-generation VMEM limit (v7x has 64 MiB/TC, v5e/v6e have 128 MiB)."""
    try:
        info = pltpu.get_tpu_info()
        cap = getattr(info, "vmem_capacity_bytes", None)
        if cap:
            return min(int(cap) * 3 // 4, 100 * 1024 * 1024)
    except Exception:
        pass
    return 64 * 1024 * 1024


def _divisors_desc(n):
    return [d for d in range(n, 0, -1) if n % d == 0]


def _keep(pred, cands):
    sel = [c for c in cands if pred(c)]
    return sel if sel else cands


def _pick_tile_h(N, H, W, Cin, Cout, vmem_budget_bytes):
    """Largest TH (rows per grid step) that is lane-aligned, fits the VMEM
    budget (double-buffered in+out blocks), keeps the output block <= 4 MiB,
    bounds the unrolled group count, and leaves >= 2 grid blocks when possible."""
    lane_valid = [th for th in _divisors_desc(H)
                  if th == H or (th * W) % 128 == 0]
    cands = _keep(lambda t: 8 * t * W * (Cin + 4 * Cout) <= vmem_budget_bytes,
                  lane_valid)
    cands = _keep(lambda t: 16 * Cout * t * W <= (4 << 20), cands)   # out blk <= 4 MiB
    cands = _keep(lambda t: t * W <= 4096, cands)                    # bounded unroll
    cands = _keep(lambda t: N * (H // t) >= 2, cands)                # >= 2 blocks
    return max(cands)


def _pick_group(TH, W):
    """Largest divisor g of TH with g*W <= 128 (full MXU K-width per dup matmul)."""
    cands = [d for d in _divisors_desc(TH) if d * W <= 128]
    return cands[0] if cands else 1


def _dup_matrix(g, W):
    """(g*W, 4*g*W) 0/1 matrix: row t_l*W + w contributes to the 4 positions
    t_l*4W + {2w, 2w+1, 2W+2w, 2W+2w+1} (both nearest-neighbour duplications)."""
    rows = jax.lax.broadcasted_iota(jnp.int32, (g * W, 4 * g * W), 0)
    cols = jax.lax.broadcasted_iota(jnp.int32, (g * W, 4 * g * W), 1)
    t_i = rows // W
    w_i = rows % W
    t_j = cols // (4 * W)
    w_j = (cols % (2 * W)) // 2
    return ((t_i == t_j) & (w_i == w_j)).astype(jnp.float32)


# ---------------------------------------------------------------------------
# Wrapper
# ---------------------------------------------------------------------------
def upsample_forward(x_nchw, conv_w, bn_gamma, bn_beta, bn_mean, bn_var, eps=1e-5):
    """Forward pass of the PyTorch `Upsample` module (eval-mode BN).

    x_nchw : (N, Cin, H, W) float32
    conv_w : (Cout, Cin, 1, 1) float32   (nn.Conv2d weight, bias=False)
    bn_*   : (Cout,) float32             (BatchNorm2d params / running stats)
    returns: (N, Cout, 2H, 2W) float32
    """
    N, Cin, H, W = x_nchw.shape
    Cout = conv_w.shape[0]
    dtype = x_nchw.dtype

    vmem_limit = _vmem_limit_bytes()
    TH = _pick_tile_h(N, H, W, Cin, Cout, int(vmem_limit * 0.6))
    g = _pick_group(TH, W)
    n_groups = TH // g

    # Fold eval-mode BN into the conv: y = (w * scale) @ x + bias.
    scale = bn_gamma / jnp.sqrt(bn_var + eps)                        # (Cout,)
    w_folded = (conv_w.reshape(Cout, Cin) * scale[:, None]).astype(jnp.float32)
    bias = (bn_beta - bn_mean * scale).reshape(Cout, 1).astype(jnp.float32)
    dup = _dup_matrix(g, W)                                          # (g*W, 4*g*W)

    # Free metadata-only reshape (merges trailing contiguous dims).
    x_flat = x_nchw.reshape(N, Cin, H * W)

    kernel = functools.partial(_upsample_kernel, n_groups=n_groups, group_w=g * W)

    flops = 2 * N * Cout * Cin * H * W + 8 * N * Cout * H * W * (g * W)
    bytes_accessed = 4 * (N * Cin * H * W + 4 * N * Cout * H * W
                          + Cout * Cin + Cout + 4 * (g * W) * (g * W))

    out_flat = pl.pallas_call(
        kernel,
        out_shape=jax.ShapeDtypeStruct((N, Cout, H * 4 * W), dtype),
        grid_spec=pltpu.PrefetchScalarGridSpec(
            num_scalar_prefetch=0,
            grid=(N, H // TH),
            in_specs=[
                pl.BlockSpec((1, Cin, TH * W), lambda n, t: (n, 0, t)),
                pl.BlockSpec((Cout, Cin), lambda n, t: (0, 0)),
                pl.BlockSpec((Cout, 1), lambda n, t: (0, 0)),
                pl.BlockSpec((g * W, 4 * g * W), lambda n, t: (0, 0)),
            ],
            out_specs=pl.BlockSpec((1, Cout, TH * 4 * W), lambda n, t: (n, 0, t)),
        ),
        compiler_params=pltpu.CompilerParams(
            dimension_semantics=("parallel", "parallel"),
            vmem_limit_bytes=vmem_limit,
        ),
        cost_estimate=pl.CostEstimate(
            flops=int(flops), transcendentals=0, bytes_accessed=int(bytes_accessed)),
    )(x_flat, w_folded, bias, dup)

    # Free metadata-only reshape: (N, Cout, H*4W) -> (N, Cout, 2H, 2W); this is
    # exactly the H-direction duplication (row t's 4W slab becomes rows 2t, 2t+1).
    return out_flat.reshape(N, Cout, 2 * H, 2 * W)


# ---------------------------------------------------------------------------
# Pure-JAX reference (same math as the PyTorch module in eval mode)
# ---------------------------------------------------------------------------
def _reference_forward(x_nchw, conv_w, bn_gamma, bn_beta, bn_mean, bn_var, eps=1e-5):
    N, Cin, H, W = x_nchw.shape
    Cout = conv_w.shape[0]
    w = conv_w.reshape(Cout, Cin)                                    # 1x1 conv == matmul
    y = jnp.einsum("oc,nchw->nohw", w, x_nchw)
    scale = bn_gamma / jnp.sqrt(bn_var + eps)
    bias = bn_beta - bn_mean * scale
    y = y * scale[None, :, None, None] + bias[None, :, None, None]
    y = jnp.where(y >= 0, y, 0.1 * y)
    y = jnp.repeat(jnp.repeat(y, 2, axis=2), 2, axis=3)
    return y


if __name__ == "__main__":
    key = jax.random.PRNGKey(0)
    k_x, k_w, k_g, k_b, k_m, k_v = jax.random.split(key, 6)

    N, Cin, Cout, H, W = 2, 4, 8, 16, 16

    x = jax.random.normal(k_x, (N, Cin, H, W), dtype=jnp.float32)

    # Deterministic synthetic parameters (shapes from nn.Conv2d / nn.BatchNorm2d).
    conv_w = jax.random.normal(k_w, (Cout, Cin, 1, 1), dtype=jnp.float32) * 0.1
    bn_gamma = 0.5 + jax.random.uniform(k_g, (Cout,), dtype=jnp.float32)
    bn_beta = jax.random.normal(k_b, (Cout,), dtype=jnp.float32) * 0.1
    bn_mean = jax.random.normal(k_m, (Cout,), dtype=jnp.float32) * 0.1
    bn_var = 0.5 + jax.random.uniform(k_v, (Cout,), dtype=jnp.float32)

    # TODO(synk): training-mode BatchNorm (batch statistics) is not implemented;
    # this kernel matches the module in eval/inference mode.
    out = upsample_forward(x, conv_w, bn_gamma, bn_beta, bn_mean, bn_var)
    out = jax.block_until_ready(out)

    ref = _reference_forward(x, conv_w, bn_gamma, bn_beta, bn_mean, bn_var)
    assert out.shape == (N, Cout, 2 * H, 2 * W), out.shape
    assert jnp.allclose(out, ref, atol=1e-4, rtol=1e-4), float(
        jnp.max(jnp.abs(out - ref))
    )

    print("KERNEL_OK")
</pallas_src>

<mosaic_0001>
module attributes {stable_mosaic.version = 11 : i64} {
  func.func @_upsample_kernel(%arg0: i32, %arg1: i32, %arg2: memref<1x4x256xf32, #tpu.memory_space<vmem>>, %arg3: memref<8x4xf32, #tpu.memory_space<vmem>>, %arg4: memref<8x1xf32, #tpu.memory_space<vmem>>, %arg5: memref<128x512xf32, #tpu.memory_space<vmem>>, %arg6: memref<1x8x1024xf32, #tpu.memory_space<vmem>>) attributes {dimension_semantics = [#tpu.dimension_semantics<parallel>, #tpu.dimension_semantics<parallel>], iteration_bounds = array<i64: 2, 1>, scalar_prefetch = 0 : i64, scratch_operands = 0 : i64, tpu.core_type = #tpu.core_type<tc>, window_params = [{transform_indices = @transform_0, window_bounds = array<i64: 1, 4, 256>}, {pipeline_mode = #tpu.pipeline_mode<synchronous>, transform_indices = @transform_1, window_bounds = array<i64: 8, 4>}, {pipeline_mode = #tpu.pipeline_mode<synchronous>, transform_indices = @transform_2, window_bounds = array<i64: 8, 1>}, {pipeline_mode = #tpu.pipeline_mode<synchronous>, transform_indices = @transform_3, window_bounds = array<i64: 128, 512>}, {transform_indices = @transform_4, window_bounds = array<i64: 1, 8, 1024>}]} {
    %c0 = arith.constant 0 : index
    %c0_0 = arith.constant 0 : index
    %c0_1 = arith.constant 0 : index
    %0 = vector.load %arg2[%c0, %c0_0, %c0_1] : memref<1x4x256xf32, #tpu.memory_space<vmem>>, vector<1x4x256xf32>
    %1 = vector.shape_cast %0 : vector<1x4x256xf32> to vector<4x256xf32>
    %c0_2 = arith.constant 0 : index
    %c0_3 = arith.constant 0 : index
    %2 = vector.load %arg3[%c0_2, %c0_3] : memref<8x4xf32, #tpu.memory_space<vmem>>, vector<8x4xf32>
    %cst = arith.constant dense<0.000000e+00> : vector<8x256xf32>
    %3 = tpu.matmul %2, %1, %cst {dimension_numbers = #tpu.dot_dimension_numbers<[1], [0], [0], [1], [0, 0, 1, 1], [], []>} : vector<8x4xf32>, vector<4x256xf32>, vector<8x256xf32> -> vector<8x256xf32>
    %c0_4 = arith.constant 0 : index
    %c0_5 = arith.constant 0 : index
    %4 = vector.load %arg4[%c0_4, %c0_5] : memref<8x1xf32, #tpu.memory_space<vmem>>, vector<8x1xf32>
    %5 = vector.broadcast %4 : vector<8x1xf32> to vector<8x256xf32>
    %6 = arith.addf %3, %5 : vector<8x256xf32>
    %cst_6 = arith.constant 1.000000e-01 : f32
    %7 = vector.broadcast %cst_6 : f32 to vector<8x256xf32>
    %8 = arith.mulf %7, %6 : vector<8x256xf32>
    %9 = arith.maximumf %6, %8 : vector<8x256xf32>
    %c0_7 = arith.constant 0 : index
    %c0_8 = arith.constant 0 : index
    %10 = vector.load %arg5[%c0_7, %c0_8] : memref<128x512xf32, #tpu.memory_space<vmem>>, vector<128x512xf32>
    %11 = vector.extract_strided_slice %9 {offsets = [0, 0], sizes = [8, 128], strides = [1, 1]} : vector<8x256xf32> to vector<8x128xf32>
    %cst_9 = arith.constant dense<0.000000e+00> : vector<8x512xf32>
    %12 = tpu.matmul %11, %10, %cst_9 {dimension_numbers = #tpu.dot_dimension_numbers<[1], [0], [0], [1], [0, 0, 1, 1], [], []>} : vector<8x128xf32>, vector<128x512xf32>, vector<8x512xf32> -> vector<8x512xf32>
    %c0_10 = arith.constant 0 : index
    %c0_11 = arith.constant 0 : index
    %c0_12 = arith.constant 0 : index
    %13 = vector.load %arg6[%c0_10, %c0_11, %c0_12] : memref<1x8x1024xf32, #tpu.memory_space<vmem>>, vector<1x8x512xf32>
    %14 = vector.shape_cast %13 : vector<1x8x512xf32> to vector<8x512xf32>
    %15 = vector.shape_cast %12 : vector<8x512xf32> to vector<1x8x512xf32>
    tpu.vector_store %arg6[%c0_10, %c0_11, %c0_12], %15 {strides = array<i32>} : memref<1x8x1024xf32, #tpu.memory_space<vmem>>, vector<1x8x512xf32>,
    %16 = vector.extract_strided_slice %9 {offsets = [0, 128], sizes = [8, 128], strides = [1, 1]} : vector<8x256xf32> to vector<8x128xf32>
    %cst_13 = arith.constant dense<0.000000e+00> : vector<8x512xf32>
    %17 = tpu.matmul %16, %10, %cst_13 {dimension_numbers = #tpu.dot_dimension_numbers<[1], [0], [0], [1], [0, 0, 1, 1], [], []>} : vector<8x128xf32>, vector<128x512xf32>, vector<8x512xf32> -> vector<8x512xf32>
    %c0_14 = arith.constant 0 : index
    %c0_15 = arith.constant 0 : index
    %c512 = arith.constant 512 : index
    %18 = vector.load %arg6[%c0_14, %c0_15, %c512] : memref<1x8x1024xf32, #tpu.memory_space<vmem>>, vector<1x8x512xf32>
    %19 = vector.shape_cast %18 : vector<1x8x512xf32> to vector<8x512xf32>
    %20 = vector.shape_cast %17 : vector<8x512xf32> to vector<1x8x512xf32>
    tpu.vector_store %arg6[%c0_14, %c0_15, %c512], %20 {strides = array<i32>} : memref<1x8x1024xf32, #tpu.memory_space<vmem>>, vector<1x8x512xf32>,
    return
  }
  func.func @transform_0(%arg0: i32, %arg1: i32) -> (i32, i32, i32) {
    %c0_i32 = arith.constant 0 : i32
    %c0_i32_0 = arith.constant 0 : i32
    return %arg0, %c0_i32, %arg1 : i32, i32, i32
  }
  func.func @transform_1(%arg0: i32, %arg1: i32) -> (i32, i32) {
    %c0_i32 = arith.constant 0 : i32
    %c0_i32_0 = arith.constant 0 : i32
    %c0_i32_1 = arith.constant 0 : i32
    return %c0_i32, %c0_i32_0 : i32, i32
  }
  func.func @transform_2(%arg0: i32, %arg1: i32) -> (i32, i32) {
    %c0_i32 = arith.constant 0 : i32
    %c0_i32_0 = arith.constant 0 : i32
    %c0_i32_1 = arith.constant 0 : i32
    return %c0_i32, %c0_i32_0 : i32, i32
  }
  func.func @transform_3(%arg0: i32, %arg1: i32) -> (i32, i32) {
    %c0_i32 = arith.constant 0 : i32
    %c0_i32_0 = arith.constant 0 : i32
    %c0_i32_1 = arith.constant 0 : i32
    return %c0_i32, %c0_i32_0 : i32, i32
  }
  func.func @transform_4(%arg0: i32, %arg1: i32) -> (i32, i32, i32) {
    %c0_i32 = arith.constant 0 : i32
    %c0_i32_0 = arith.constant 0 : i32
    return %arg0, %c0_i32, %arg1 : i32, i32, i32
  }
}

</mosaic_0001>

<bundles_post_ra>
// kernel: tpu_custom_call.1
= control target key start
LH: loop header
LB: loop body
LE: loop exit
PB: predicated region body
PF: predicated region fallthrough
CT: control target
= control target key end

     0   :  { %9 = vsyncpa [#allocation3], 0  ;;  %s1732_s0 = inlined_call_operand.hbm [shape: f32[2,4,256], index: 0, kind: input, shape index: {}]   ;;  %s1733_s1 = inlined_call_operand.hbm [shape: f32[8,4], index: 1, kind: input, shape index: {}]   ;;  %s1734_s2 = inlined_call_operand.hbm [shape: f32[8,1], index: 2, kind: input, shape index: {}]   ;;  %s1735_s3 = inlined_call_operand.hbm [shape: f32[128,512], index: 3, kind: input, shape index: {}]   ;;  %s1736_s4 = inlined_call_operand.hbm [shape: f32[2,8,1024], index: 4, kind: output, shape index: {}]  }
   0x1   :  { %11 = vsyncpa [#allocation3 + $0x1], 0 }
   0x2   :  { %12 = vsyncpa [#allocation6], 0 }
   0x3   :  { %13 = vsyncpa [#allocation9], 0 }
   0x4   :  { %14 = vsyncpa [#allocation4], 0 }
   0x5   :  { %16 = vsyncpa [#allocation4 + $0x1], 0  ;;  %s1347_s15 = smov 0   ;;  %s1349_s16 = smov 0  }
   0x6   :  { %s1351_s17 = smov 0   ;;  %s1353_s18 = smov 0  }
   0x7   :  { %s1355_s19 = smov 0   ;;  %s1357_s20 = smov 0  }
   0x8 LB: > { %s854_s21 = sadd.s32 4294967295, %s1311_s20   ;;  %s855_s22 = sadd.s32 4294967294, %s1311_s20   ;;  %s1311_s20 = sphi %s1357_s20, %s22_s20   ;;  %s1307_s19 = sphi %s1355_s19, %s1760_s19   ;;  %s1303_s18 = sphi %s1353_s18, %s1759_s18   ;;  %s1299_s17 = sphi %s1351_s17, %s1758_s17   ;;  %s1295_s16 = sphi %s1349_s16, %s1757_s16   ;;  %s1291_s15 = sphi %s1347_s15, %s1756_s15  }
   0x9   : > { %p56_p0 = scmp.ne.s32.totalorder %s1295_s16, %s1291_s15  ;;  %p1381_p1 = scmp.eq.s32.totalorder %s854_s21, 0 }
   0xa   : > { %p1385_p2 = scmp.eq.s32.totalorder %s854_s21, 1  ;;  %p151_p3 = scmp.eq.s32.totalorder %s855_s22, 1 }
   0xb   : > { %s1741_s23 = scalar_select %p1381_p1, 1, 0 }
   0xc   : > { %s1742_s24 = scalar_select %p1385_p2, 1, 0 }
   0xd   : > { %p1391_p4 = por %p1381_p1, %p56_p0  ;;  %p856_p5 = scmp.ge.s32.totalorder %s1311_s20, 1 }
   0xe   : > { %p1396_p6 = por %p151_p3, %p56_p0  ;;  %p158_p7 = scmp.lt.s32.totalorder %s1311_s20, 3 }
   0xf   : > { %s1743_s25 = scalar_select %p1391_p4, 1, 0 }
  0x10   : > { %s1744_s26 = scalar_select %p1396_p6, 1, 0 }
  0x11   : > { %p1401_p8 = pnand %p856_p5, %p158_p7  ;;  %s1313_s28 = smov [#allocation5]  }
  0x12   : > { %s171_s29 = sshll.u32 %s1313_s28, 4  ;;  %s1314_s30 = smov [#allocation7]   ;;  %s172_s29 = int_to_ptr.vmem [resolvable:$true] %s171_s29 }
  0x13   : > { %s1745_s27 = scalar_select %p1401_p8, 1, 0 }
  0x14   : > { %p1024_p10 = pneg %p1401_p8  ;;  %s182_s5 = sshll.u32 %s1314_s30, 4  ;;  %s1414_s5 = int_to_ptr.vmem [resolvable:$true] %s182_s5 }
  0x15   : > { %s1315_s7 = smov [#allocation8]   ;;  %s1107_s11 = scalar_lea.hbm %s1733_s1, 128 }
  0x16   : > { %p1410_p11 = pnand %p1024_p10, %p1381_p1  ;;  %s192_s8 = sshll.u32 %s1315_s7, 4  ;;  %s1416_s8 = int_to_ptr.vmem [resolvable:$true] %s192_s8 }
  0x17   : > { %p1108_p12 = scmp.ne.s32.totalorder %s1733_s1, %s1107_s11  ;;  %p1114_p5 = scmp.lt.u32.totalorder %s1107_s11, %s1733_s1 }
  0x18   : > { %p1426_p13 = pneg %p1410_p11 }
  0x1a   : > { %p1110_p0 = pnand %p1426_p13, %p1108_p12 }
  0x1c   : > { %p1111_p3 = pneg %p1110_p0 }
  0x1e   : > { %p1116_p7 = pnand %p1114_p5, %p1111_p3 }
  0x20   : > { %1119 = shalt.err (!%p1116_p7)
}
  0x21   : > { %s1120_s28 = scalar_lea.vmem %s172_s29, 128  ;;  %p1128_p1 = scmp.lt.s32.totalorder %s172_s29, %s172_s29 }
  0x22   : > { %p1121_p10 = scmp.ne.s32.totalorder %s172_s29, %s1120_s28  ;;  %p1129_p4 = scmp.lt.s32.totalorder %s1120_s28, %s1120_s28 }
  0x24   : > { %p1123_p9 = pnand %p1121_p10, %p1426_p13  ;;  %p1130_p8 = por %p1129_p4, %p1128_p1 }
  0x26   : > { %p1124_p6 = pneg %p1123_p9 }
  0x28   : > { %p1131_p2 = pnand %p1130_p8, %p1124_p6 }
  0x2a   : > { %1134 = shalt.err (!%p1131_p2)
}
  0x2b   : > { %1027 = dma.hbm_to_vmem [thread:$0]  (!%p1410_p11), %s1733_s1, 128, %s172_s29, [#allocation6]  }
  0x2c   : > { %s1135_s11 = scalar_lea.hbm %s1734_s2, 128 }
  0x2d   : > { %p1136_p9 = scmp.ne.s32.totalorder %s1734_s2, %s1135_s11  ;;  %p1142_p2 = scmp.lt.u32.totalorder %s1135_s11, %s1734_s2 }
  0x2f   : > { %p1138_p12 = pnand %p1136_p9, %p1426_p13 }
  0x31   : > { %p1139_p1 = pneg %p1138_p12 }
  0x33   : > { %p1144_p4 = pnand %p1142_p2, %p1139_p1 }
  0x35   : > { %1147 = shalt.err (!%p1144_p4)
}
  0x36   : > { %s1148_s29 = scalar_lea.vmem %s1414_s5, 128  ;;  %p1156_p3 = scmp.lt.s32.totalorder %s1414_s5, %s1414_s5 }
  0x37   : > { %p1149_p6 = scmp.ne.s32.totalorder %s1414_s5, %s1148_s29  ;;  %p1157_p5 = scmp.lt.s32.totalorder %s1148_s29, %s1148_s29 }
  0x39   : > { %p1151_p8 = pnand %p1149_p6, %p1426_p13  ;;  %p1158_p7 = por %p1157_p5, %p1156_p3 }
  0x3b   : > { %p1152_p0 = pneg %p1151_p8 }
  0x3d   : > { %p1159_p10 = pnand %p1158_p7, %p1152_p0 }
  0x3f   : > { %1162 = shalt.err (!%p1159_p10)
}
  0x40   : > { %1030 = dma.hbm_to_vmem [thread:$0]  (!%p1410_p11), %s1734_s2, 128, %s1414_s5, [#allocation6]  }
  0x41   : > { %s1163_s10 = scalar_lea.hbm %s1735_s3, 8192 }
  0x42   : > { %p1164_p9 = scmp.ne.s32.totalorder %s1735_s3, %s1163_s10  ;;  %p1170_p2 = scmp.lt.u32.totalorder %s1163_s10, %s1735_s3 }
  0x44   : > { %p1166_p12 = pnand %p1164_p9, %p1426_p13 }
  0x46   : > { %p1167_p1 = pneg %p1166_p12 }
  0x48   : > { %p1172_p4 = pnand %p1170_p2, %p1167_p1 }
  0x4a   : > { %1175 = shalt.err (!%p1172_p4)
}
  0x4b   : > { %s1176_s5 = scalar_lea.vmem %s1416_s8, 8192  ;;  %p1184_p3 = scmp.lt.s32.totalorder %s1416_s8, %s1416_s8 }
  0x4c   : > { %p1177_p6 = scmp.ne.s32.totalorder %s1416_s8, %s1176_s5  ;;  %p1185_p5 = scmp.lt.s32.totalorder %s1176_s5, %s1176_s5 }
  0x4e   : > { %p1179_p8 = pnand %p1177_p6, %p1426_p13  ;;  %p1186_p7 = por %p1185_p5, %p1184_p3 }
  0x50   : > { %p1180_p0 = pneg %p1179_p8 }
  0x52   : > { %p1187_p10 = pnand %p1186_p7, %p1180_p0 }
  0x54   : > { %1190 = shalt.err (!%p1187_p10)
}
  0x55   : > { %s1316_s22 = smov 512   ;;  %s1317_s14 = smov 32  }
  0x56   : > { %1033 = dma.hbm_to_vmem [thread:$0]  (!%p1410_p11), %s1735_s3, 8192, %s1416_s8, [#allocation9], %s1316_s22, %s1316_s22, %s1317_s14  }
  0x57   : > { %s43_s30 = sadd.s32 1, %s1299_s17  ;;  %s34_s7 = sadd.s32 1, %s1307_s19 }
  0x58   : > { %p50_p13 = scmp.ne.s32.totalorder %s1299_s17, %s1295_s16  ;;  %p36_p9 = scmp.ge.s32.totalorder %s34_s7, 2 }
  0x59   : > { %p51_p12 = scmp.eq.s32.totalorder %s1311_s20, 0  ;;  %p1748_p1 = scmp.ne.s32.totalorder %s1742_s24, 0 }
  0x5a   : > { %p1045_p4 = scmp.lt.s32.totalorder %s1311_s20, 2  ;;  %s1762_s7 = smov (%p36_p9, %s34_s7), 0 }
  0x5b   : > { %p1495_p2 = por %p1748_p1, %p50_p13  ;;  %p52_p6 = por %p51_p12, %p50_p13 }
  0x5c   : > { %s206_s6 = sand.u32 1, %s1299_s17   ;;  %s38_s10 = ssub.s32 %s1307_s19, %s1762_s7 }
  0x5d   : > { %p41_p8 = scmp.eq.s32.totalorder %s38_s10, 0  ;;  %s861_s8 = sshll.u32 %s206_s6, 3 }
  0x5e   : > { %s878_s11 = sshll.u32 %s1307_s19, 7  ;;  %s210_s5 = scalar_lea.vmem [#allocation2], %s861_s8 }
  0x5f   : > { %s1507_s12 = scalar_select %p41_p8, %s1299_s17, %s43_s30  }
  0x60   : > { %s1512_s24 = scalar_lea.hbm %s1732_s0, %s878_s11  ;;  %s220_s22 = sshll.u32 %s210_s5, 4  ;;  %s1514_s22 = int_to_ptr.vmem [resolvable:$true] %s220_s22 }
  0x61   : > { %p1518_p11 = pnand %p1045_p4, %p52_p6  ;;  %s207_s29 = scalar_lea.sflag [#allocation3], %s206_s6 }
  0x62   : > { %s1191_s28 = scalar_lea.hbm %s1512_s24, 128  ;;  %s1196_s8 = scalar_lea.hbm %s1732_s0, 256 }
  0x63   : > { %p1192_p0 = scmp.ne.s32.totalorder %s1512_s24, %s1191_s28  ;;  %p1193_p3 = pneg %p1518_p11 }
  0x64   : > { %p1197_p10 = scmp.lt.u32.totalorder %s1512_s24, %s1732_s0  ;;  %p1198_p13 = scmp.lt.u32.totalorder %s1196_s8, %s1191_s28 }
  0x65   : > { %p1194_p5 = pnand %p1193_p3, %p1192_p0  ;;  %p1200_p12 = scmp.lt.u32.totalorder %s1191_s28, %s1512_s24 }
  0x66   : > { %p1199_p9 = por %p1198_p13, %p1197_p10 }
  0x67   : > { %p1195_p7 = pneg %p1194_p5 }
  0x68   : > { %p1201_p1 = por %p1200_p12, %p1199_p9 }
  0x6a   : > { %p1202_p4 = pnand %p1201_p1, %p1195_p7 }
  0x6c   : > { %1205 = shalt.err (!%p1202_p4)
}
  0x6d   : > { %s1206_s6 = scalar_lea.vmem %s1514_s22, 128  ;;  %s1318_s21 = smov [#allocation2]  }
  0x6e   : > { %p1207_p6 = scmp.ne.s32.totalorder %s1514_s22, %s1206_s6  ;;  %s1211_s5 = sshll.u32 %s1318_s21, 4  ;;  %s1212_s5 = int_to_ptr.vmem [resolvable:$false] %s1211_s5 }
  0x6f   : > { %s1213_s30 = scalar_lea.vmem %s1212_s5, 256  ;;  %p1214_p5 = scmp.lt.s32.totalorder %s1514_s22, %s1212_s5 }
  0x70   : > { %p1209_p8 = pnand %p1207_p6, %p1193_p3  ;;  %p1215_p10 = scmp.lt.s32.totalorder %s1213_s30, %s1206_s6 }
  0x72   : > { %p1210_p0 = pneg %p1209_p8  ;;  %p1216_p13 = por %p1215_p10, %p1214_p5 }
  0x74   : > { %p1217_p9 = pnand %p1216_p13, %p1210_p0 }
  0x76   : > { %1220 = shalt.err (!%p1217_p9)
}
  0x77   : > { %1037 = dma.hbm_to_vmem [thread:$0]  (!%p1518_p11), %s1512_s24, 128, %s1514_s22, %s207_s29  }
  0x78   : > { %p1751_p7 = scmp.ne.s32.totalorder %s1745_s27, 0 }
  0x79   : > { %s1550_s28 = sand.u32 (!%p1751_p7), 1, %s1295_s16   ;;  %p1752_p3 = scmp.ne.s32.totalorder (!%p1751_p7), %s1743_s25, 0 }
  0x7a   : > { %229 = sbr.rel (%p1751_p7) target bundleno = 617 (0x269), region = 36  ;;  %s865_s10 = sshll.u32 (!%p1751_p7), %s1550_s28, 3 }
  0x7b   : > { %s232_s8 = scalar_lea.sflag (!%p1751_p7), [#allocation3], %s1550_s28  ;;  %s235_s11 = scalar_lea.vmem (!%p1751_p7), [#allocation2], %s865_s10 }
  0x81   : > { %1274 = dma.done.wait (%p1752_p3), %s232_s8, 128  }
  0x82   : > { %1276 = vsyncadd (%p1752_p3), %s232_s8, 4294967168  ;;  %p1753_p12 = scmp.ne.s32.totalorder %s1741_s23, 0 }
  0x84   : > { %1278 = dma.done.wait (%p1753_p12), [#allocation6], 256  }
  0x85   : > { %1280 = vsyncadd (%p1753_p12), [#allocation6], 4294967040 }
  0x86   : > { %1282 = dma.done.wait (%p1753_p12), [#allocation9], 8192  }
  0x87   : > { %1284 = vsyncadd (%p1753_p12), [#allocation9], 4294959104  ;;  %v1319_v0 = vmov 0.0   ;;  %v1320_v1 = vmov 0   ;;  %v274_v2 = vld [vmem:[%s235_s11] sm:$0xff]  ;;  %vm288_vm0 = vcmask 1043456  }
  0x88   : > { %357 = vmatprep.mubr.f32.mxu0 %v1319_v0  ;;  %1105 = vset.pattern.permute.xlu0 %v1320_v1  ;;  %v275_v3 = vld [vmem:[#allocation5] sm:$0xff]  ;;  %v276_v4 = vld [vmem:[#allocation7] sm:$0xff]  ;;  %v283_v5 = vcombine.high %v274_v2, %v274_v2  ;;  %v369_v6 = vld [vmem:[#allocation8 + $0x8] sm:$0xff]  ;;  %vm284_vm1 = vcmask 31744   ;;  %s869_s23 = sshll.u32 %s1550_s28, 6  ;;  %s879_s27 = sshll.u32 %s1303_s18, 10 }
  0x89   : > { %496 = vmatprep.mubr.f32.mxu1 %v1319_v0  ;;  %279 = vperm.xlu0 %1105, %v276_v4   ;;  %v373_v7 = vld [vmem:[#allocation8 + $0x28] sm:$0xff]  ;;  %v371_v8 = vld [vmem:[#allocation8 + $0x18] sm:$0xff]  ;;  %v368_v11 = vld [vmem:[#allocation8] sm:$0xff]  ;;  %s271_s25 = scalar_lea.vmem [#allocation10], %s869_s23  ;;  %s1683_s29 = scalar_lea.hbm %s1736_s4, %s879_s27 }
  0x8a   : > { %v1568_v9 = vpack.c.bf16 %v373_v7, %v369_v6  ;;  %v375_v10 = vld [vmem:[#allocation8 + $0x38] sm:$0xff]  ;;  %v372_v12 = vld [vmem:[#allocation8 + $0x20] sm:$0xff]  ;;  %870 = vmatprep.subr.msk.mxu0 %vm288_vm0, %v283_v5  ;;  %v370_v15 = vld [vmem:[#allocation8 + $0x10] sm:$0xff]  ;;  %s741_s24 = sshll.u32 %s271_s25, 4  ;;  %s725_s18 = scalar_lea.sflag [#allocation4], %s1550_s28  ;;  %s1685_s24 = int_to_ptr.vmem [resolvable:$true] %s741_s24 }
  0x8b   : > { %v1571_v13 = vpack.c.bf16 %v375_v10, %v371_v8  ;;  %v1573_v14 = vpack.c.bf16 %v372_v12, %v368_v11  ;;  %v374_v16 = vld [vmem:[#allocation8 + $0x30] sm:$0xff]  ;;  %v377_v17 = vld [vmem:[#allocation8 + $0x48] sm:$0xff]  ;;  %871 = vmatpush1.msk.msra.mxu0 %vm288_vm0, %v274_v2  ;;  %v379_v20 = vld [vmem:[#allocation8 + $0x58] sm:$0xff]  ;;  %s1221_s13 = scalar_lea.vmem %s1685_s24, 1024  ;;  %s1321_s6 = smov [#allocation10]  }
  0x8c   : > { %881 = vmatprep.subr.bf16.mxu1 %v1568_v9  ;;  %v1577_v18 = vpack.c.bf16 %v374_v16, %v370_v15  ;;  %v381_v19 = vld [vmem:[#allocation8 + $0x68] sm:$0xff]  ;;  %v383_v21 = vld [vmem:[#allocation8 + $0x78] sm:$0xff]  ;;  %872 = vmatmul.mubr.msk.f32.vlgmr.msra.gmra.mrb[0].mxu0 %vm284_vm1, %v275_v3  ;;  %v376_v24 = vld [vmem:[#allocation8 + $0x40] sm:$0xff]  ;;  %p1222_p11 = scmp.ne.s32.totalorder %s1685_s24, %s1221_s13  ;;  %s1225_s21 = sshll.u32 %s1321_s6, 4  ;;  %s1226_s21 = int_to_ptr.vmem [resolvable:$false] %s1225_s21 }
  0x8d   : > { %913 = vmatprep.subr.bf16.mxu0 %v1571_v13  ;;  %v1581_v22 = vpack.c.bf16 %v381_v19, %v377_v17  ;;  %v1583_v23 = vpack.c.bf16 %v383_v21, %v379_v20  ;;  %v380_v25 = vld [vmem:[#allocation8 + $0x60] sm:$0xff]  ;;  %v378_v26 = vld [vmem:[#allocation8 + $0x50] sm:$0xff]  ;;  %883 = vmatpush1.bf16.msra.mxu1 %v1573_v14  ;;  %v385_v29 = vld [vmem:[#allocation8 + $0x88] sm:$0xff]  ;;  %s1227_s5 = scalar_lea.vmem %s1226_s21, 2048  ;;  %p1228_p6 = scmp.lt.s32.totalorder %s1685_s24, %s1226_s21 }
  0x8e   : > { %915 = vmatpush1.bf16.msra.mxu0 %v1577_v18  ;;  %v1587_v27 = vpack.c.bf16 %v380_v25, %v376_v24  ;;  %v382_v28 = vld [vmem:[#allocation8 + $0x70] sm:$0xff]  ;;  %v389_v30 = vld [vmem:[#allocation8 + $0xa8] sm:$0xff]  ;;  %v387_v33 = vld [vmem:[#allocation8 + $0x98] sm:$0xff]  ;;  %567 = vmatprep.mubr.f32.mxu0 %v1319_v0  ;;  %p1223_p1 = pnand %p1222_p11, %p1495_p2  ;;  %p1229_p8 = scmp.lt.s32.totalorder %s1227_s5, %s1221_s13 }
  0x8f   : > { %885 = vmatprep.subr.bf16.mxu1 %v1581_v22  ;;  %917 = vmatprep.subr.bf16.mxu0 %v1583_v23  ;;  %v1591_v31 = vpack.c.bf16 %v382_v28, %v378_v26  ;;  %v1593_v32 = vpack.c.bf16 %v389_v30, %v385_v29  ;;  %v391_v34 = vld [vmem:[#allocation8 + $0xb8] sm:$0xff]  ;;  %v384_v35 = vld [vmem:[#allocation8 + $0x80] sm:$0xff]  ;;  %v386_v38 = vld [vmem:[#allocation8 + $0x90] sm:$0xff] }
  0x90   : > { %v1595_v36 = vpack.c.bf16 %v391_v34, %v387_v33  ;;  %v388_v37 = vld [vmem:[#allocation8 + $0xa0] sm:$0xff]  ;;  %v390_v39 = vld [vmem:[#allocation8 + $0xb0] sm:$0xff]  ;;  %v393_v40 = vld [vmem:[#allocation8 + $0xc8] sm:$0xff]  ;;  %p1224_p4 = pneg %p1223_p1  ;;  %p1230_p0 = por %p1229_p8, %p1228_p6 }
  0x91   : > { %v397_v41 = vld [vmem:[#allocation8 + $0xe8] sm:$0xff]  ;;  %v395_v42 = vld [vmem:[#allocation8 + $0xd8] sm:$0xff]  ;;  %887 = vmatpush1.bf16.msra.mxu1 %v1587_v27  ;;  %v1600_v43 = vpack.c.bf16 %v388_v37, %v384_v35  ;;  %v1602_v44 = vpack.c.bf16 %v390_v39, %v386_v38  ;;  %v392_v46 = vld [vmem:[#allocation8 + $0xc0] sm:$0xff] }
  0x92   : > { %919 = vmatpush1.bf16.msra.mxu0 %v1591_v31  ;;  %v399_v45 = vld [vmem:[#allocation8 + $0xf8] sm:$0xff]  ;;  %v396_v47 = vld [vmem:[#allocation8 + $0xe0] sm:$0xff]  ;;  %889 = vmatprep.subr.bf16.mxu1 %v1593_v32  ;;  %v1606_v48 = vpack.c.bf16 %v397_v41, %v393_v40  ;;  %v394_v50 = vld [vmem:[#allocation8 + $0xd0] sm:$0xff]  ;;  %p1231_p5 = pnand %p1230_p0, %p1224_p4 }
  0x93   : > { %921 = vmatprep.subr.bf16.mxu0 %v1595_v36  ;;  %v1608_v49 = vpack.c.bf16 %v399_v45, %v395_v42  ;;  %v398_v51 = vld [vmem:[#allocation8 + $0xf0] sm:$0xff]  ;;  %v401_v52 = vld [vmem:[#allocation8 + $0x108] sm:$0xff]  ;;  %v403_v54 = vld [vmem:[#allocation8 + $0x118] sm:$0xff]  ;;  %v1612_v56 = vpack.c.bf16 %v396_v47, %v392_v46 }
  0x94   : > { %v405_v53 = vld [vmem:[#allocation8 + $0x128] sm:$0xff]  ;;  %v407_v55 = vld [vmem:[#allocation8 + $0x138] sm:$0xff]  ;;  %v1614_v57 = vpack.c.bf16 %v398_v51, %v394_v50  ;;  %v400_v58 = vld [vmem:[#allocation8 + $0x100] sm:$0xff] }
  0x95   : > { %891 = vmatpush1.bf16.msra.mxu1 %v1600_v43  ;;  %v404_v59 = vld [vmem:[#allocation8 + $0x120] sm:$0xff]  ;;  %v1618_v60 = vpack.c.bf16 %v405_v53, %v401_v52  ;;  %v1620_v61 = vpack.c.bf16 %v407_v55, %v403_v54  ;;  %v402_v62 = vld [vmem:[#allocation8 + $0x110] sm:$0xff]  ;;  %v409_v1 = vld [vmem:[#allocation8 + $0x148] sm:$0xff] }
  0x96   : > { %923 = vmatpush1.bf16.msra.mxu0 %v1602_v44  ;;  %893 = vmatprep.subr.bf16.mxu1 %v1606_v48  ;;  %v406_v63 = vld [vmem:[#allocation8 + $0x130] sm:$0xff]  ;;  %v413_v2 = vld [vmem:[#allocation8 + $0x168] sm:$0xff]  ;;  %v411_v3 = vld [vmem:[#allocation8 + $0x158] sm:$0xff]  ;;  %v1624_v5 = vpack.c.bf16 %v404_v59, %v400_v58 }
  0x97   : > { %925 = vmatprep.subr.bf16.mxu0 %v1608_v49  ;;  %v415_v4 = vld [vmem:[#allocation8 + $0x178] sm:$0xff]  ;;  %v1626_v6 = vpack.c.bf16 %v406_v63, %v402_v62  ;;  %v408_v7 = vld [vmem:[#allocation8 + $0x140] sm:$0xff]  ;;  %v1630_v10 = vpack.c.bf16 %v413_v2, %v409_v1  ;;  %v410_v12 = vld [vmem:[#allocation8 + $0x150] sm:$0xff] }
  0x98   : > { %v412_v8 = vld [vmem:[#allocation8 + $0x160] sm:$0xff]  ;;  %v1632_v11 = vpack.c.bf16 %v415_v4, %v411_v3  ;;  %v414_v15 = vld [vmem:[#allocation8 + $0x170] sm:$0xff]  ;;  %v417_v16 = vld [vmem:[#allocation8 + $0x188] sm:$0xff] }
  0x99   : > { %895 = vmatpush1.bf16.msra.mxu1 %v1612_v56  ;;  %v421_v17 = vld [vmem:[#allocation8 + $0x1a8] sm:$0xff]  ;;  %v419_v19 = vld [vmem:[#allocation8 + $0x198] sm:$0xff]  ;;  %v1636_v21 = vpack.c.bf16 %v412_v8, %v408_v7  ;;  %v1638_v24 = vpack.c.bf16 %v414_v15, %v410_v12  ;;  %v416_v25 = vld [vmem:[#allocation8 + $0x180] sm:$0xff] }
  0x9a   : > { %927 = vmatpush1.bf16.msra.mxu0 %v1614_v57  ;;  %897 = vmatprep.subr.bf16.mxu1 %v1618_v60  ;;  %v423_v20 = vld [vmem:[#allocation8 + $0x1b8] sm:$0xff]  ;;  %v1642_v26 = vpack.c.bf16 %v421_v17, %v417_v16  ;;  %v420_v29 = vld [vmem:[#allocation8 + $0x1a0] sm:$0xff]  ;;  %v418_v30 = vld [vmem:[#allocation8 + $0x190] sm:$0xff] }
  0x9b   : > { %929 = vmatprep.subr.bf16.mxu0 %v1620_v61  ;;  %v1644_v28 = vpack.c.bf16 %v423_v20, %v419_v19  ;;  %v422_v33 = vld [vmem:[#allocation8 + $0x1b0] sm:$0xff]  ;;  %v906_v34 = vpack.c.bf16 %v420_v29, %v416_v25  ;;  %v425_v37 = vld [vmem:[#allocation8 + $0x1c8] sm:$0xff]  ;;  %v427_v39 = vld [vmem:[#allocation8 + $0x1d8] sm:$0xff] }
  0x9c   : > { %v938_v35 = vpack.c.bf16 %v422_v33, %v418_v30  ;;  %v429_v38 = vld [vmem:[#allocation8 + $0x1e8] sm:$0xff]  ;;  %v431_v41 = vld [vmem:[#allocation8 + $0x1f8] sm:$0xff]  ;;  %v424_v42 = vld [vmem:[#allocation8 + $0x1c0] sm:$0xff] }
  0x9d   : > { %899 = vmatpush1.bf16.msra.mxu1 %v1624_v5  ;;  %v908_v40 = vpack.c.bf16 %v429_v38, %v425_v37  ;;  %v428_v45 = vld [vmem:[#allocation8 + $0x1e0] sm:$0xff]  ;;  %v940_v46 = vpack.c.bf16 %v431_v41, %v427_v39  ;;  %v426_v50 = vld [vmem:[#allocation8 + $0x1d0] sm:$0xff] }
  0x9e   : > { %931 = vmatpush1.bf16.msra.mxu0 %v1626_v6  ;;  %901 = vmatprep.subr.bf16.mxu1 %v1630_v10  ;;  %v910_v47 = vpack.c.bf16 %v428_v45, %v424_v42  ;;  %v430_v51 = vld [vmem:[#allocation8 + $0x1f0] sm:$0xff] }
  0x9f   : > { %933 = vmatprep.subr.bf16.mxu0 %v1632_v11  ;;  %v942_v52 = vpack.c.bf16 %v430_v51, %v426_v50 }
  0xa1   : > { %903 = vmatpush1.bf16.msra.mxu1 %v1636_v21 }
  0xa2   : > { %935 = vmatpush1.bf16.msra.mxu0 %v1638_v24  ;;  %905 = vmatprep.subr.bf16.mxu1 %v1642_v26 }
  0xa3   : > { %937 = vmatprep.subr.bf16.mxu0 %v1644_v28 }
  0xa5   : > { %907 = vmatpush1.bf16.msra.mxu1 %v906_v34 }
  0xa6   : > { %939 = vmatpush1.bf16.msra.mxu0 %v938_v35  ;;  %909 = vmatprep.subr.bf16.mxu1 %v908_v40 }
  0xa7   : > { %941 = vmatprep.subr.bf16.mxu0 %v940_v46 }
  0xa9   : > { %911 = vmatpush1.bf16.msra.mxu1 %v910_v47 }
  0xaa   : > { %943 = vmatpush1.bf16.msra.mxu0 %v942_v52  ;;  %945 = vmatprep.subr.bf16.mxu1 %v1568_v9 }
  0xab   : > { %977 = vmatprep.subr.bf16.mxu0 %v1571_v13 }
 0x108   : > { %v280_v53 = vpop.permute.xlu0 %279 }
 0x15f   : > { %v359_v54 = vpop.f32.mrb[0].mxu0 }
 0x160   : > { %v360_v55 = vadd.f32 %v359_v54, %v280_v53  ;;  %v361_v58 = vpop.f32.mrb[1].mxu0 }
 0x162   : > { %v364_v59 = vmul.f32 0.1, %v360_v55 }
 0x164   : > { %v366_v62 = vmax.f32 %v360_v55, %v364_v59 }
 0x166   : > { %497 = vmatmul.mubr.f32.vlgmr.msra.gmra.mrb[0].mxu1 %v366_v62  ;;  %568 = vmatmul.mubr.f32.vlgmr.msra.gmra.mrb[2].mxu0 %v366_v62 }
 0x167   : > { %947 = vmatpush1.bf16.msra.mxu1 %v1573_v14  ;;  %979 = vmatpush1.bf16.msra.mxu0 %v1577_v18 }
 0x168   : > { %949 = vmatprep.subr.bf16.mxu1 %v1581_v22  ;;  %981 = vmatprep.subr.bf16.mxu0 %v1583_v23 }
 0x169   : > { %642 = vmatprep.mubr.f32.mxu1 %v1319_v0  ;;  %713 = vmatprep.mubr.f32.mxu0 %v1319_v0  ;;  %v362_v0 = vadd.f32 %v361_v58, %v280_v53 }
 0x16b   : > { %951 = vmatpush1.bf16.msra.mxu1 %v1587_v27  ;;  %983 = vmatpush1.bf16.msra.mxu0 %v1591_v31  ;;  %v365_v9 = vmul.f32 0.1, %v362_v0 }
 0x16c   : > { %953 = vmatprep.subr.bf16.mxu1 %v1593_v32  ;;  %985 = vmatprep.subr.bf16.mxu0 %v1595_v36 }
 0x16d   : > { %v367_v13 = vmax.f32 %v362_v0, %v365_v9 }
 0x16f   : > { %955 = vmatpush1.bf16.msra.mxu1 %v1600_v43  ;;  %987 = vmatpush1.bf16.msra.mxu0 %v1602_v44 }
 0x170   : > { %957 = vmatprep.subr.bf16.mxu1 %v1606_v48  ;;  %989 = vmatprep.subr.bf16.mxu0 %v1608_v49 }
 0x173   : > { %959 = vmatpush1.bf16.msra.mxu1 %v1612_v56  ;;  %991 = vmatpush1.bf16.msra.mxu0 %v1614_v57 }
 0x174   : > { %961 = vmatprep.subr.bf16.mxu1 %v1618_v60  ;;  %993 = vmatprep.subr.bf16.mxu0 %v1620_v61 }
 0x177   : > { %963 = vmatpush1.bf16.msra.mxu1 %v1624_v5  ;;  %995 = vmatpush1.bf16.msra.mxu0 %v1626_v6 }
 0x178   : > { %965 = vmatprep.subr.bf16.mxu1 %v1630_v10  ;;  %997 = vmatprep.subr.bf16.mxu0 %v1632_v11 }
 0x17b   : > { %967 = vmatpush1.bf16.msra.mxu1 %v1636_v21  ;;  %999 = vmatpush1.bf16.msra.mxu0 %v1638_v24 }
 0x17c   : > { %969 = vmatprep.subr.bf16.mxu1 %v1642_v26  ;;  %1001 = vmatprep.subr.bf16.mxu0 %v1644_v28 }
 0x17f   : > { %971 = vmatpush1.bf16.msra.mxu1 %v906_v34  ;;  %1003 = vmatpush1.bf16.msra.mxu0 %v938_v35 }
 0x180   : > { %973 = vmatprep.subr.bf16.mxu1 %v908_v40  ;;  %1005 = vmatprep.subr.bf16.mxu0 %v940_v46 }
 0x183   : > { %975 = vmatpush1.bf16.msra.mxu1 %v910_v47  ;;  %1007 = vmatpush1.bf16.msra.mxu0 %v942_v52 }
 0x186   : > { %643 = vmatmul.mubr.f32.vlgmr.msra.gmra.mrb[2].mxu1 %v367_v13  ;;  %714 = vmatmul.mubr.f32.vlgmr.msra.gmra.mrb[4].mxu0 %v367_v13 }
 0x239   : > { %v498_v14 = vpop.f32.mrb[0].mxu1  ;;  %v569_v18 = vpop.f32.mrb[2].mxu0 }
 0x23a   : > { %574 = vst [vmem:[%s271_s25] sm:$0xff] %v498_v14  ;;  %576 = vst [vmem:[%s271_s25 + $0x10] sm:$0xff] %v569_v18  ;;  %v500_v22 = vpop.f32.mrb[1].mxu1  ;;  %v571_v23 = vpop.f32.mrb[3].mxu0 }
 0x23b   : > { %575 = vst [vmem:[%s271_s25 + $0x8] sm:$0xff] %v500_v22  ;;  %577 = vst [vmem:[%s271_s25 + $0x18] sm:$0xff] %v571_v23 }
 0x259   : > { %v644_v27 = vpop.f32.mrb[2].mxu1  ;;  %v715_v31 = vpop.f32.mrb[4].mxu0 }
 0x25a   : > { %720 = vst [vmem:[%s271_s25 + $0x20] sm:$0xff] %v644_v27  ;;  %722 = vst [vmem:[%s271_s25 + $0x30] sm:$0xff] %v715_v31  ;;  %v646_v32 = vpop.f32.mrb[3].mxu1  ;;  %v717_v36 = vpop.f32.mrb[5].mxu0 }
 0x25b   : > { %721 = vst [vmem:[%s271_s25 + $0x28] sm:$0xff] %v646_v32  ;;  %723 = vst [vmem:[%s271_s25 + $0x38] sm:$0xff] %v717_v36 }
 0x25c   : > { %1234 = shalt.err (!%p1231_p5)
}
 0x25d   : > { %s1235_s30 = scalar_lea.hbm %s1683_s29, 1024  ;;  %s1239_s8 = scalar_lea.hbm %s1736_s4, 2048 }
 0x25e   : > { %p1236_p10 = scmp.ne.s32.totalorder %s1683_s29, %s1235_s30  ;;  %p1240_p7 = scmp.lt.u32.totalorder %s1683_s29, %s1736_s4 }
 0x25f   : > { %p1241_p3 = scmp.lt.u32.totalorder %s1239_s8, %s1235_s30  ;;  %p1243_p11 = scmp.lt.u32.totalorder %s1235_s30, %s1683_s29 }
 0x260   : > { %p1237_p13 = pnand %p1236_p10, %p1495_p2 }
 0x261   : > { %p1242_p12 = por %p1241_p3, %p1240_p7 }
 0x262   : > { %p1238_p9 = pneg %p1237_p13 }
 0x263   : > { %p1244_p1 = por %p1243_p11, %p1242_p12 }
 0x265   : > { %p1245_p4 = pnand %p1244_p1, %p1238_p9 }
 0x267   : > { %1248 = shalt.err (!%p1245_p4)
}
 0x268   : > { %1022 = dma.vmem_to_hbm [thread:$0]  (%p1495_p2), %s1685_s24, 1024, %s1683_s29, %s725_s18  }
 0x269 PF: > { %s753_s25 = sand.u32 1, %s1291_s15   ;;  %p1754_p6 = scmp.ne.s32.totalorder %s1744_s26, 0 }
 0x26a   : > { %p1755_p8 = scmp.ge.s32.totalorder %s1311_s20, 2  ;;  %s754_s27 = scalar_lea.sflag [#allocation4], %s753_s25 }
 0x26c   : > { %p1039_p0 = pnand %p1755_p8, %p1754_p6 }
 0x26e   : > { %1286 = dma.done.wait (!%p1039_p0), %s754_s27, 1024  }
 0x26f   : > { %1288 = vsyncadd (!%p1039_p0), %s754_s27, 4294966272  ;;  %s22_s20 = sadd.s32 1, %s1311_s20   ;;  %s1756_s15 = smov %s1295_s16 }
 0x270   : > { %p19_p5 = scmp.ge.s32.totalorder %s22_s20, 4   ;;  %s1757_s16 = smov %s1299_s17 }
 0x271   : > { %s1758_s17 = smov %s1507_s12  ;;  %s1759_s18 = smov %s1307_s19 }
 0x272   : > { %s1760_s19 = smov %s1762_s7  ;;  %21 = sbr.rel (!%p19_p5) target bundleno = 8 (0x8), region = 93 }
 0x279   :  { %759 = vsyncpa [#allocation3], 1 }
 0x27a   :  { %761 = vsyncpa [#allocation3 + $0x1], 1 }
 0x27b   :  { %762 = vsyncpa [#allocation6], 1 }
 0x27c   :  { %763 = vsyncpa [#allocation9], 1 }
 0x27d   :  { %764 = vsyncpa [#allocation4], 1 }
 0x27e   :  { %766 = vsyncpa [#allocation4 + $0x1], 1 }

</bundles_post_ra>
